<compile_context>
chip_gen: v7x
topology: tpu7x:2x2x1
jax: 0.10.0
libtpu: 0.0.40
codegen_flags: <defaults>
</compile_context>

<pallas_src>
import functools

import jax
import jax.numpy as jnp
from jax.experimental import pallas as pl
from jax.experimental.pallas import tpu as pltpu


# --------------------------------------------------------------------------
# Kernels
# --------------------------------------------------------------------------
def _softmax_pieces(cols, radix):
    """Softmax over `radix` same-shaped f32 slabs; returns the radix outputs."""
    if radix == 2:
        # softmax([x0, x1]) == [1 - s, s] with s = sigmoid(x1 - x0):
        # one EUP op instead of 2x exp + reciprocal + Newton.
        s = jax.nn.sigmoid(cols[1] - cols[0])
        return [1.0 - s, s]
    m = cols[0]
    for j in range(1, radix):
        m = jnp.maximum(m, cols[j])
    exps = [jnp.exp(c - m) for c in cols]
    denom = exps[0]
    for j in range(1, radix):
        denom = denom + exps[j]
    inv = pl.reciprocal(denom, approx=True)     # EUP slot (~free)
    inv = inv * (2.0 - denom * inv)             # 1 Newton step -> ~f32 exact
    return [e * inv for e in exps]


def _radix_softmax_kernel_flat(x_ref, o_ref, *, radix, cardinality, group):
    """Flat-row kernel: one dense load, one dense full-width store.

    x_ref: (TB, N) block, per-row input layout (card, radix, group).
    o_ref: (TB, N) block, per-row output layout (radix, card, group), i.e.
           torch's  view(B, card, radix, -1).transpose(1, 2).reshape(B, -1).
    """
    x = x_ref[...]                                   # single dense load, native dtype
    outs = [None] * (radix * cardinality)
    for c in range(cardinality):
        base = c * radix * group
        # Slab-wise slices of the register-resident block; per-slice f32 upcast
        # keeps the f32 working set small (no full-block upcast).
        cols = [x[:, base + j * group: base + (j + 1) * group].astype(jnp.float32)
                for j in range(radix)]
        pieces = _softmax_pieces(cols, radix)
        for j in range(radix):
            outs[j * cardinality + c] = pieces[j]
    # Assemble the permuted row in registers (XLU) and store once, lane-dense.
    result = jnp.concatenate(outs, axis=-1)          # (TB, N) in output order
    o_ref[...] = result.astype(o_ref.dtype)


def _radix_softmax_kernel_grouped(x_ref, o_ref, *, radix, cardinality):
    """Column-tiled kernel for large C*H*W.

    x_ref: (TB, card*radix, TG) block of the (batch, card*radix, group) view.
    o_ref: (TB, radix*card, TG) block of the (batch, radix*card, group) view.
    Every load / store here is a full-lane-width (TG) row, so it stays
    lane-dense; the softmax never crosses a column tile.
    """
    for c in range(cardinality):
        cols = [x_ref[:, c * radix + j, :].astype(jnp.float32)
                for j in range(radix)]
        pieces = _softmax_pieces(cols, radix)
        for j in range(radix):
            o_ref[:, j * cardinality + c, :] = pieces[j].astype(o_ref.dtype)


def _sigmoid_kernel(x_ref, o_ref):
    o_ref[...] = jax.nn.sigmoid(x_ref[...].astype(jnp.float32)).astype(o_ref.dtype)


# --------------------------------------------------------------------------
# Tiling heuristics
# --------------------------------------------------------------------------
def _vmem_budget_bytes():
    """Per-generation block budget; always below the default scoped-VMEM limit."""
    kind = ""
    try:
        kind = jax.devices()[0].device_kind.lower()
    except Exception:
        pass
    if "v6" in kind:                      # v6e: 32 MiB default scoped -> bigger blocks
        return 20 * 1024 * 1024
    if "v5 lite" in kind or "v5lite" in kind or "v5e" in kind:
        return 5 * 1024 * 1024            # v5e: 16 MiB default scoped -> stay well under
    return 8 * 1024 * 1024                # v7x (64 MiB phys) / v5p / unknown: conservative


def _pick_block_rows(batch, n, itemsize, radix, budget, sub):
    """Rows per grid step, or None if even `sub` rows exceed the budget.

    per_row counts the double-buffered in+out pipeline blocks at the real
    itemsize PLUS the in-kernel f32 working set (upcast slabs + the assembled
    full-width output before the store).
    """
    per_row = 4 * n * itemsize + (1 + min(radix, 4)) * n * 4
    rows_fit = budget // max(per_row, 1)
    if rows_fit < 1:
        return None
    if rows_fit >= batch:
        rows = batch
    else:
        rows = (rows_fit // sub) * sub
        if rows < sub:
            return None
    # Prefer >= 2 grid steps (v7x has 2 TensorCores) and ~4 steps once the
    # batch is split anyway, so double-buffering actually overlaps DMA/compute.
    if batch > sub:
        target = 4 if batch >= 4 * sub else 2
        cap = -(-batch // target)                 # ceil(batch / target)
        cap = -(-cap // sub) * sub                # round up to sublane multiple
        rows = min(rows, cap)
    return int(rows)


def _pick_col_tile(group, tb, middle, itemsize, budget):
    """Group-axis tile (multiple of 128 lanes) for the column-tiled fallback."""
    per_col = tb * middle * (4 * itemsize + 8)    # 2x(in+out) buffers + ~2 f32 temps
    fit = budget // max(per_col, 1)
    if fit >= group or group <= 128:
        return int(group)
    return int(max(128, (min(fit, group) // 128) * 128))


# --------------------------------------------------------------------------
# Wrapper
# --------------------------------------------------------------------------
def radix_softmax(x, radix, cardinality, *, block_rows=None, block_cols=None):
    """Forward pass of RadixSoftmax.

    x: (batch, channels, H, W) -- NCHW, like the PyTorch module.
    returns: (batch, channels*H*W) for radix > 1 (softmax over the radix axis),
             x.shape for radix == 1 (elementwise sigmoid), matching torch.
    """
    batch = x.shape[0]
    n = 1
    for d in x.shape[1:]:
        n *= d
    itemsize = jnp.dtype(x.dtype).itemsize
    sub = max(8, 32 // max(itemsize, 1))          # 8 f32 / 16 bf16 / 32 int8 rows
    budget = _vmem_budget_bytes()
    cost = pl.CostEstimate(
        flops=5 * batch * n,
        transcendentals=batch * n,
        bytes_accessed=2 * batch * n * itemsize)
    xf = x.reshape(batch, n)                      # free row-major view

    # ---- radix == 1: elementwise sigmoid, original shape preserved --------
    if radix == 1:
        tb = block_rows if block_rows is not None else _pick_block_rows(
            batch, n, itemsize, 1, budget, sub)
        if tb is None:
            tb = min(batch, sub)
            tn = _pick_col_tile(n, tb, 1, itemsize, budget)
        else:
            tn = n
        if block_cols is not None:
            tn = block_cols
        out = pl.pallas_call(
            _sigmoid_kernel,
            out_shape=jax.ShapeDtypeStruct((batch, n), x.dtype),
            grid=(pl.cdiv(batch, tb), pl.cdiv(n, tn)),
            in_specs=[pl.BlockSpec((tb, tn), lambda b, c: (b, c))],
            out_specs=pl.BlockSpec((tb, tn), lambda b, c: (b, c)),
            compiler_params=pltpu.CompilerParams(
                dimension_semantics=("parallel", "parallel")),
            cost_estimate=cost,
        )(xf)
        return out.reshape(x.shape)

    # ---- radix > 1: transpose-folded softmax over the radix axis ----------
    if n % (cardinality * radix) != 0:
        raise ValueError(
            f"channels*H*W={n} not divisible by cardinality*radix="
            f"{cardinality * radix}")
    group = n // (cardinality * radix)            # = r * H * W
    cr = cardinality * radix

    use_cols = block_cols is not None
    tb = block_rows
    if tb is None and not use_cols:
        tb = _pick_block_rows(batch, n, itemsize, radix, budget, sub)
        if tb is None:                            # one row alone blows the budget
            use_cols = True

    if use_cols:
        # Column-tiled fallback for large C*H*W (bounds VMEM, keeps pipelining).
        if tb is None:
            tb = min(batch, sub)
        tg = block_cols if block_cols is not None else _pick_col_tile(
            group, tb, cr, itemsize, budget)
        x3 = xf.reshape(batch, cr, group)         # free view: (card, radix, group)
        kernel = functools.partial(
            _radix_softmax_kernel_grouped, radix=radix, cardinality=cardinality)
        out = pl.pallas_call(
            kernel,
            out_shape=jax.ShapeDtypeStruct((batch, cr, group), x.dtype),
            grid=(pl.cdiv(batch, tb), pl.cdiv(group, tg)),
            in_specs=[pl.BlockSpec((tb, cr, tg), lambda b, g: (b, 0, g))],
            out_specs=pl.BlockSpec((tb, cr, tg), lambda b, g: (b, 0, g)),
            compiler_params=pltpu.CompilerParams(
                dimension_semantics=("parallel", "parallel")),
            cost_estimate=cost,
        )(x3)
        return out.reshape(batch, n)              # torch's reshape(batch, -1)

    kernel = functools.partial(
        _radix_softmax_kernel_flat, radix=radix, cardinality=cardinality,
        group=group)
    out = pl.pallas_call(
        kernel,
        out_shape=jax.ShapeDtypeStruct((batch, n), x.dtype),
        grid=(pl.cdiv(batch, tb),),
        in_specs=[pl.BlockSpec((tb, n), lambda b: (b, 0))],
        out_specs=pl.BlockSpec((tb, n), lambda b: (b, 0)),
        compiler_params=pltpu.CompilerParams(
            dimension_semantics=("parallel",)),
        cost_estimate=cost,
    )(xf)
    return out                                    # already torch's reshape(batch, -1)


def _reference(x, radix, cardinality):
    """Pure-JAX reference mirroring the PyTorch forward exactly."""
    batch = x.shape[0]
    if radix > 1:
        xr = x.reshape(batch, cardinality, radix, -1)
        xr = jnp.transpose(xr, (0, 2, 1, 3))
        xr = jax.nn.softmax(xr, axis=1)
        return xr.reshape(batch, -1)
    return jax.nn.sigmoid(x)


if __name__ == "__main__":
    key = jax.random.PRNGKey(0)
    k0, k1, k2, k3, k4 = jax.random.split(key, 5)

    # 1) Typical ResNeSt SplAt case (radix==2 fast path): radix=2, card=2, r=4.
    batch, radix, cardinality, r = 2, 2, 2, 4
    channels = radix * cardinality * r                        # 16
    x = jax.random.normal(k0, (batch, channels, 1, 1), dtype=jnp.float32)
    out = jax.block_until_ready(radix_softmax(x, radix, cardinality))
    ref = _reference(x, radix, cardinality)
    assert out.shape == (batch, channels), out.shape
    assert jnp.allclose(out, ref, atol=1e-3, rtol=1e-3), "mismatch (radix=2)"

    # 2) Spatial extent + multi-step 'parallel' batch grid (auto tb -> 2 steps).
    x2 = jax.random.normal(k1, (16, channels, 2, 2), dtype=jnp.float32)
    out2 = jax.block_until_ready(radix_softmax(x2, radix, cardinality))
    ref2 = _reference(x2, radix, cardinality)
    assert out2.shape == (16, channels * 4), out2.shape
    assert jnp.allclose(out2, ref2, atol=1e-3, rtol=1e-3), "mismatch (spatial)"

    # 3) radix=3: exercises the generic max/exp/reciprocal+Newton path.
    x3 = jax.random.normal(k2, (8, 12, 1, 1), dtype=jnp.float32)   # 2*3*group
    out3 = jax.block_until_ready(radix_softmax(x3, radix=3, cardinality=2))
    ref3 = _reference(x3, 3, 2)
    assert out3.shape == (8, 12), out3.shape
    assert jnp.allclose(out3, ref3, atol=1e-3, rtol=1e-3), "mismatch (radix=3)"

    # 4) radix == 1 branch: elementwise sigmoid, original shape preserved.
    x4 = jax.random.normal(k3, (batch, 8, 1, 1), dtype=jnp.float32)
    out4 = jax.block_until_ready(radix_softmax(x4, radix=1, cardinality=1))
    ref4 = _reference(x4, 1, 1)
    assert out4.shape == x4.shape, out4.shape
    assert jnp.allclose(out4, ref4, atol=1e-5, rtol=1e-5), "mismatch (sigmoid)"

    # 5) Column-tiled fallback path (forced via block_cols) for large C*H*W.
    x5 = jax.random.normal(k4, (4, 16, 16, 8), dtype=jnp.float32)  # n=2048, group=512
    out5 = jax.block_until_ready(
        radix_softmax(x5, radix, cardinality, block_cols=256))
    ref5 = _reference(x5, radix, cardinality)
    assert out5.shape == (4, 2048), out5.shape
    assert jnp.allclose(out5, ref5, atol=1e-3, rtol=1e-3), "mismatch (grouped)"

    print("KERNEL_OK")
</pallas_src>

<mosaic_0001>
module attributes {stable_mosaic.version = 11 : i64} {
  func.func @_radix_softmax_kernel_flat(%arg0: i32, %arg1: memref<2x16xf32, #tpu.memory_space<vmem>>, %arg2: memref<2x16xf32, #tpu.memory_space<vmem>>) attributes {dimension_semantics = [#tpu.dimension_semantics<parallel>], iteration_bounds = array<i64: 1>, scalar_prefetch = 0 : i64, scratch_operands = 0 : i64, tpu.core_type = #tpu.core_type<tc>, window_params = [{transform_indices = @transform_0, window_bounds = array<i64: 2, 16>}, {transform_indices = @transform_1, window_bounds = array<i64: 2, 16>}]} {
    %c0 = arith.constant 0 : index
    %c0_0 = arith.constant 0 : index
    %0 = vector.load %arg1[%c0, %c0_0] : memref<2x16xf32, #tpu.memory_space<vmem>>, vector<2x16xf32>
    %1 = vector.extract_strided_slice %0 {offsets = [0, 0], sizes = [2, 4], strides = [1, 1]} : vector<2x16xf32> to vector<2x4xf32>
    %2 = vector.extract_strided_slice %0 {offsets = [0, 4], sizes = [2, 4], strides = [1, 1]} : vector<2x16xf32> to vector<2x4xf32>
    %3 = arith.subf %2, %1 : vector<2x4xf32>
    %4 = arith.negf %3 : vector<2x4xf32>
    %5 = math.exp %4 : vector<2x4xf32>
    %cst = arith.constant 1.000000e+00 : f32
    %6 = vector.broadcast %cst : f32 to vector<2x4xf32>
    %7 = arith.addf %6, %5 : vector<2x4xf32>
    %8 = arith.divf %6, %7 : vector<2x4xf32>
    %cst_1 = arith.constant 1.000000e+00 : f32
    %9 = vector.broadcast %cst_1 : f32 to vector<2x4xf32>
    %10 = arith.subf %9, %8 : vector<2x4xf32>
    %11 = vector.extract_strided_slice %0 {offsets = [0, 8], sizes = [2, 4], strides = [1, 1]} : vector<2x16xf32> to vector<2x4xf32>
    %12 = vector.extract_strided_slice %0 {offsets = [0, 12], sizes = [2, 4], strides = [1, 1]} : vector<2x16xf32> to vector<2x4xf32>
    %13 = arith.subf %12, %11 : vector<2x4xf32>
    %14 = arith.negf %13 : vector<2x4xf32>
    %15 = math.exp %14 : vector<2x4xf32>
    %cst_2 = arith.constant 1.000000e+00 : f32
    %16 = vector.broadcast %cst_2 : f32 to vector<2x4xf32>
    %17 = arith.addf %16, %15 : vector<2x4xf32>
    %18 = arith.divf %16, %17 : vector<2x4xf32>
    %cst_3 = arith.constant 1.000000e+00 : f32
    %19 = vector.broadcast %cst_3 : f32 to vector<2x4xf32>
    %20 = arith.subf %19, %18 : vector<2x4xf32>
    %21 = tpu.concatenate %10, %20, %8, %18 in 1 : vector<2x4xf32>, vector<2x4xf32>, vector<2x4xf32>, vector<2x4xf32> -> vector<2x16xf32>
    %c0_4 = arith.constant 0 : index
    %c0_5 = arith.constant 0 : index
    %22 = vector.load %arg2[%c0_4, %c0_5] : memref<2x16xf32, #tpu.memory_space<vmem>>, vector<2x16xf32>
    tpu.vector_store %arg2[%c0_4, %c0_5], %21 {strides = array<i32>} : memref<2x16xf32, #tpu.memory_space<vmem>>, vector<2x16xf32>,
    return
  }
  func.func @transform_0(%arg0: i32) -> (i32, i32) {
    %c0_i32 = arith.constant 0 : i32
    %c0_i32_0 = arith.constant 0 : i32
    return %arg0, %c0_i32 : i32, i32
  }
  func.func @transform_1(%arg0: i32) -> (i32, i32) {
    %c0_i32 = arith.constant 0 : i32
    %c0_i32_0 = arith.constant 0 : i32
    return %arg0, %c0_i32 : i32, i32
  }
}

</mosaic_0001>

<bundles_post_ra>
// kernel: tpu_custom_call.1
= control target key start
LH: loop header
LB: loop body
LE: loop exit
PB: predicated region body
PF: predicated region fallthrough
CT: control target
= control target key end

     0   :  { %6 = vsyncpa [#allocation3], 0  ;;  %s165_s0 = inlined_call_operand.hbm [shape: f32[2,16], index: 0, kind: input, shape index: {}]   ;;  %s166_s1 = inlined_call_operand.hbm [shape: f32[2,16], index: 1, kind: output, shape index: {}]  }
   0x1   :  { %7 = vsyncpa [#allocation4], 0  ;;  %s126_s6 = smov [#allocation2]   ;;  %s78_s10 = scalar_lea.hbm %s165_s0, 32 }
   0x2   :  { %s14_s7 = sshll.u32 %s126_s6, 4  ;;  %p79_p0 = scmp.ne.s32.totalorder %s165_s0, %s78_s10  ;;  %s15_s7 = int_to_ptr.vmem [resolvable:$true] %s14_s7 }
   0x3   :  { %p82_p1 = scmp.lt.u32.totalorder %s78_s10, %s165_s0 }
   0x5   :  { %p84_p2 = pnand %p82_p1, %p79_p0 }
   0x7   :  { %87 = shalt.err (!%p84_p2)
}
   0x8   :  { %s88_s15 = scalar_lea.vmem %s15_s7, 32  ;;  %p93_p4 = scmp.lt.s32.totalorder %s15_s7, %s15_s7 }
   0x9   :  { %p89_p3 = scmp.ne.s32.totalorder %s15_s7, %s88_s15  ;;  %p94_p5 = scmp.lt.s32.totalorder %s88_s15, %s88_s15 }
   0xb   :  { %p95_p6 = por %p94_p5, %p93_p4 }
   0xd   :  { %p96_p7 = pnand %p95_p6, %p89_p3 }
   0xf   :  { %99 = shalt.err (!%p96_p7)
}
  0x10   :  { %17 = dma.hbm_to_vmem [thread:$0]  %s165_s0, 32, %s15_s7, [#allocation3]  }
  0x11   :  { %122 = dma.done.wait [#allocation3], 32  }
  0x12   :  { %123 = vsyncadd [#allocation3], 4294967264  ;;  %v21_v0 = vld [vmem:[#allocation2] sm:$0x3]  ;;  %s127_s18 = smov 4   ;;  %s128_s19 = smov 120  }
  0x13   :  { %23 = vrot.lane.b32.xlu0 %v21_v0, %s127_s18  ;;  %s129_s20 = smov 124   ;;  %vm45_vm0 = vcmask 31744   ;;  %vm47_vm1 = vcmask 64512   ;;  %s130_s0 = smov [#allocation5]   ;;  %vm49_vm2 = vcmask 97280   ;;  %vm51_vm3 = vcmask 123904  }
  0x14   :  { %s59_s21 = sshll.u32 %s130_s0, 4  ;;  %s60_s21 = int_to_ptr.vmem [resolvable:$true] %s59_s21 }
  0x15   :  { %s100_s22 = scalar_lea.vmem %s60_s21, 32  ;;  %p105_p9 = scmp.lt.s32.totalorder %s60_s21, %s60_s21 }
  0x16   :  { %p101_p8 = scmp.ne.s32.totalorder %s60_s21, %s100_s22  ;;  %p106_p10 = scmp.lt.s32.totalorder %s100_s22, %s100_s22 }
  0x18   :  { %p107_p11 = por %p106_p10, %p105_p9 }
  0x1a   :  { %p108_p12 = pnand %p107_p11, %p101_p8 }
  0x85   :  { %v24_v1 = vpop.permute.xlu0 %23 }
  0x86   :  { %v26_v2 = vsub.f32 %v21_v0, %v24_v1 }
  0x88   :  { %v68_v3 = vmul.f32 -1.442695, %v26_v2 }
  0x8a   :  { %74 = vpow2.f32 %v68_v3 }
  0x94   :  { %v75_v4 = vpop.eup %74 }
  0x95   :  { %v30_v5 = vadd.f32 1.0, %v75_v4 }
  0x97   :  { %76 = vrcp.f32 %v30_v5 }
  0xa1   :  { %v77_v6 = vpop.eup %76 }
  0xa2   :  { %v33_v7 = vsub.f32 1.0, %v77_v6 }
  0xa4   :  { %38 = vrot.lane.b32.xlu1 %v33_v7, %s128_s19  ;;  %35 = vrot.lane.b32.xlu0 %v33_v7, %s129_s20 }
  0xa8   :  { %42 = vrot.lane.b32.xlu1 %v77_v6, %s127_s18 }
 0x116   :  { %v39_v8 = vpop.permute.xlu1 %38  ;;  %v36_v9 = vpop.permute.xlu0 %35 }
 0x117   :  { %v46_v10 = vsel %vm45_vm0, %v36_v9, %v39_v8 }
 0x11a   :  { %v43_v11 = vpop.permute.xlu1 %42 }
 0x11b   :  { %v48_v12 = vsel %vm47_vm1, %v46_v10, %v43_v11 }
 0x11c   :  { %v50_v13 = vsel %vm49_vm2, %v48_v12, %v77_v6 }
 0x11d   :  { %52 = vst.msk [vmem:[#allocation5] sm:$0x3] %vm51_vm3, %v50_v13 }
 0x11e   :  { %111 = shalt.err (!%p108_p12)
}
 0x11f   :  { %s112_s25 = scalar_lea.hbm %s166_s1, 32 }
 0x120   :  { %p113_p13 = scmp.ne.s32.totalorder %s166_s1, %s112_s25  ;;  %p116_p0 = scmp.lt.u32.totalorder %s112_s25, %s166_s1 }
 0x122   :  { %p118_p1 = pnand %p116_p0, %p113_p13 }
 0x124   :  { %121 = shalt.err (!%p118_p1)
}
 0x125   :  { %62 = dma.vmem_to_hbm [thread:$0]  %s60_s21, 32, %s166_s1, [#allocation4]  }
 0x126   :  { %124 = dma.done.wait [#allocation4], 32  }
 0x127   :  { %125 = vsyncadd [#allocation4], 4294967264 }
 0x128   :  { %66 = vsyncpa [#allocation3], 1 }
 0x129   :  { %67 = vsyncpa [#allocation4], 1 }

</bundles_post_ra>
